<compile_context>
chip_gen: v7x
topology: tpu7x:2x2x1
jax: 0.10.0
libtpu: 0.0.40
codegen_flags: <defaults>
</compile_context>

<pallas_src>
import functools

import jax
import jax.numpy as jnp
from jax import lax
from jax.experimental import pallas as pl
from jax.experimental.pallas import tpu as pltpu

_EPS = 1e-5
_LANE = 128


def _round_up(x, m):
    return (x + m - 1) // m * m


# ----------------------------- Pallas kernel ---------------------------------
def _make_conv_kernel(tile_m, w_cols, with_residual):
    """Fused 3x3-conv (as 3 H-tap GEMMs) + BN bias (+ residual) + ReLU."""
    two_w = 2 * w_cols

    def kernel(*refs):
        if with_residual:
            main_ref, halo1_ref, halo2_ref, w_ref, b_ref, res_ref, out_ref, win_ref = refs
        else:
            main_ref, halo1_ref, halo2_ref, w_ref, b_ref, out_ref, win_ref = refs
            res_ref = None

        # Assemble the halo'd row window in VMEM: tile_m rows + 2 halo rows
        # (offsets are multiples of W -> aligned sublane slices).
        win_ref[0:tile_m, :] = main_ref[...]
        win_ref[tile_m:tile_m + w_cols, :] = halo1_ref[...]
        win_ref[tile_m + w_cols:tile_m + two_w, :] = halo2_ref[...]

        # 3 H-taps: shifted views of the window, each a (tile_m, K3p) GEMM
        # against the resident per-kh weight slab.  f32 accumulation.
        acc = jnp.dot(win_ref[0:tile_m, :], w_ref[0],
                      preferred_element_type=jnp.float32)
        acc = acc + jnp.dot(win_ref[w_cols:w_cols + tile_m, :], w_ref[1],
                            preferred_element_type=jnp.float32)
        acc = acc + jnp.dot(win_ref[two_w:two_w + tile_m, :], w_ref[2],
                            preferred_element_type=jnp.float32)

        acc = acc + b_ref[...]                      # folded BN bias (1, Co_p)
        if res_ref is not None:
            acc = acc + res_ref[...].astype(jnp.float32)
        out_ref[...] = jnp.maximum(acc, 0.0).astype(out_ref.dtype)

    return kernel


# ------------------------------ host-side prep -------------------------------
def _expand_w_taps(x_nhwc, k3p):
    """(N,H,W,C) -> (N,(H+2)*W, k3p) bf16 with the 3 W-taps concatenated on K.

    One fused pad+slice+concat+cast; only the W-taps are expanded (3x, not 9x).
    Channel layout of the last dim is kw*C + c, matching the folded weights.
    """
    n, h, w, c = x_nhwc.shape
    xp = jnp.pad(x_nhwc, ((0, 0), (1, 1), (1, 1), (0, 0)))
    taps = [xp[:, :, kw:kw + w, :] for kw in range(3)]        # each (N,H+2,W,C)
    xw = jnp.concatenate(taps, axis=-1).astype(jnp.bfloat16)  # (N,H+2,W,3C)
    if 3 * c < k3p:
        xw = jnp.pad(xw, ((0, 0), (0, 0), (0, 0), (0, k3p - 3 * c)))
    return xw.reshape(n, (h + 2) * w, k3p)


def _fold_bn_weights(w_oihw, bn_params, k3p, co_p):
    """Per-kh weight slabs (3, k3p, co_p) with BN scale folded in, plus bias."""
    gamma, beta, mean, var = bn_params
    scale = gamma / jnp.sqrt(var + _EPS)                      # (Co,)
    bias = beta - mean * scale                                # (Co,)
    co, ci, kh, kw = w_oihw.shape
    w = jnp.transpose(w_oihw, (2, 3, 1, 0)) * scale           # (kh, kw, Ci, Co)
    w = w.reshape(kh, kw * ci, co)                            # rows = kw*Ci + c
    wmat = jnp.zeros((kh, k3p, co_p), jnp.float32).at[:, :kw * ci, :co].set(w)
    bias_p = jnp.zeros((1, co_p), jnp.float32).at[0, :co].set(bias)
    return wmat.astype(jnp.bfloat16), bias_p


# ------------------------------ kernel wrapper --------------------------------
def _conv3x3_bn_relu(x_nhwc, w_oihw, bn_params, residual=None,
                     out_dtype=jnp.float32, tile_m_target=512):
    """relu(BN(conv3x3(x)) [+ residual]) -> (N, H*W, co_p) in `out_dtype`."""
    n, h, w, cin = x_nhwc.shape
    co = w_oihw.shape[0]
    assert w_oihw.shape[1] == cin and w_oihw.shape[2:] == (3, 3)
    assert w % 8 == 0, "TODO(synk): W not a multiple of 8 is unsupported"

    k3p = _round_up(3 * cin, _LANE)           # lane-dense K (3 W-taps * Cin)
    co_p = _round_up(co, _LANE)               # lane-dense output channels

    # Row-tile picker: ~tile_m_target output pixels per step, tile_h | H.
    tile_h = max(1, min(h, tile_m_target // w))
    while h % tile_h:
        tile_h -= 1
    tile_m = tile_h * w
    n_tiles = h // tile_h
    hw = h * w

    xw = _expand_w_taps(x_nhwc, k3p)                          # (N,(H+2)*W,k3p) bf16
    wmat, bias = _fold_bn_weights(w_oihw, bn_params, k3p, co_p)

    main_spec = pl.BlockSpec((None, tile_m, k3p), lambda b, i: (b, i, 0))
    halo1_spec = pl.BlockSpec((None, w, k3p), lambda b, i: (b, (i + 1) * tile_h, 0))
    halo2_spec = pl.BlockSpec((None, w, k3p), lambda b, i: (b, (i + 1) * tile_h + 1, 0))
    w_spec = pl.BlockSpec((3, k3p, co_p), lambda b, i: (0, 0, 0))    # VMEM-resident
    b_spec = pl.BlockSpec((1, co_p), lambda b, i: (0, 0))            # VMEM-resident
    out_spec = pl.BlockSpec((None, tile_m, co_p), lambda b, i: (b, i, 0))

    in_specs = [main_spec, halo1_spec, halo2_spec, w_spec, b_spec]
    args = [xw, xw, xw, wmat, bias]
    if residual is not None:
        in_specs.append(pl.BlockSpec((None, tile_m, co_p), lambda b, i: (b, i, 0)))
        args.append(residual)

    out_bytes = n * hw * co_p * jnp.dtype(out_dtype).itemsize
    res_bytes = 0 if residual is None else residual.size * residual.dtype.itemsize
    cost = pl.CostEstimate(
        flops=2 * n * hw * (3 * k3p) * co_p,
        transcendentals=0,
        bytes_accessed=(xw.size * 2 + n * n_tiles * 2 * w * k3p * 2
                        + wmat.size * 2 + bias.size * 4 + out_bytes + res_bytes))

    kernel = _make_conv_kernel(tile_m, w, residual is not None)

    return pl.pallas_call(
        kernel,
        out_shape=jax.ShapeDtypeStruct((n, hw, co_p), out_dtype),
        grid_spec=pltpu.PrefetchScalarGridSpec(
            num_scalar_prefetch=0,
            grid=(n, n_tiles),
            in_specs=in_specs,
            out_specs=out_spec,
            scratch_shapes=[pltpu.VMEM((tile_m + 2 * w, k3p), jnp.bfloat16)]),
        compiler_params=pltpu.CompilerParams(
            dimension_semantics=("parallel", "parallel"),
            vmem_limit_bytes=48 * 1024 * 1024),      # safe on v7x's 64 MiB too
        cost_estimate=cost,
    )(*args)


# --------------------------------- forward ------------------------------------
def basic_block_forward(x_nchw, params, stride=1, tile_m_target=512):
    """BasicBlock.forward (eval-mode BN), downsample=None, identity residual."""
    # TODO(synk): stride>1 / external downsample module not implemented.
    assert stride == 1, "only stride=1, downsample=None is implemented"
    n, cin, h, w = x_nchw.shape
    planes = params["w1"].shape[0]
    assert cin == planes, "identity residual requires inplanes == planes"

    x = jnp.transpose(x_nchw, (0, 2, 3, 1)).astype(jnp.float32)    # NHWC
    co_p = _round_up(planes, _LANE)

    # conv1 -> bn1 -> relu   (bf16 intermediate, no residual stream)
    out1 = _conv3x3_bn_relu(x, params["w1"], params["bn1"], residual=None,
                            out_dtype=jnp.bfloat16, tile_m_target=tile_m_target)
    out1 = out1[:, :, :planes].reshape(n, h, w, planes)

    # identity residual: flattened, channel-padded, bf16 (added in f32 in-kernel)
    res = jnp.pad(x.astype(jnp.bfloat16).reshape(n, h * w, cin),
                  ((0, 0), (0, 0), (0, co_p - cin)))

    # conv2 -> bn2 -> (+ residual) -> relu
    out2 = _conv3x3_bn_relu(out1, params["w2"], params["bn2"], residual=res,
                            out_dtype=jnp.float32, tile_m_target=tile_m_target)
    out2 = out2[:, :, :planes].reshape(n, h, w, planes)
    return jnp.transpose(out2, (0, 3, 1, 2))                       # NCHW


# ---------------------------- pure-JAX reference ------------------------------
def _ref_forward(x, params):
    def conv(hh, ww):
        return lax.conv_general_dilated(
            hh, ww, (1, 1), ((1, 1), (1, 1)),
            dimension_numbers=("NCHW", "OIHW", "NCHW"))

    def bn(hh, p):
        g, b, m, v = p
        inv = 1.0 / jnp.sqrt(v + _EPS)
        return (hh - m[None, :, None, None]) * inv[None, :, None, None] * \
            g[None, :, None, None] + b[None, :, None, None]

    out = jax.nn.relu(bn(conv(x, params["w1"]), params["bn1"]))
    out = bn(conv(out, params["w2"]), params["bn2"])
    return jax.nn.relu(out + x)


# ----------------------------------- main --------------------------------------
if __name__ == "__main__":
    key = jax.random.PRNGKey(0)
    kx, kw1, kw2, kg1, kb1, km1, kv1, kg2, kb2, km2, kv2 = jax.random.split(key, 11)

    N, inplanes, planes, H, W = 2, 4, 4, 16, 16     # stride=1, downsample=None

    x = jax.random.normal(kx, (N, inplanes, H, W), jnp.float32)

    params = {
        "w1": jax.random.normal(kw1, (planes, inplanes, 3, 3), jnp.float32) * 0.2,
        "w2": jax.random.normal(kw2, (planes, planes, 3, 3), jnp.float32) * 0.2,
        "bn1": (
            jax.random.uniform(kg1, (planes,), jnp.float32, 0.5, 1.5),   # gamma
            jax.random.normal(kb1, (planes,), jnp.float32) * 0.1,        # beta
            jax.random.normal(km1, (planes,), jnp.float32) * 0.1,        # running_mean
            jax.random.uniform(kv1, (planes,), jnp.float32, 0.5, 1.5),   # running_var
        ),
        "bn2": (
            jax.random.uniform(kg2, (planes,), jnp.float32, 0.5, 1.5),
            jax.random.normal(kb2, (planes,), jnp.float32) * 0.1,
            jax.random.normal(km2, (planes,), jnp.float32) * 0.1,
            jax.random.uniform(kv2, (planes,), jnp.float32, 0.5, 1.5),
        ),
    }

    # Small row-tile target so the 16x16 test exercises multi-row-tile + halo
    # indexing (default stays 512 for real stage sizes).
    fwd = jax.jit(functools.partial(basic_block_forward, stride=1,
                                    tile_m_target=128))
    out = jax.block_until_ready(fwd(x, params))
    ref = jax.block_until_ready(jax.jit(_ref_forward)(x, params))

    assert out.shape == (N, planes, H, W), out.shape
    # bf16 MXU operands + bf16 intermediate through two chained convs with f32
    # accumulation -> loosened tolerance (expected precision change).
    assert jnp.allclose(out, ref, atol=2e-1, rtol=2e-2), \
        float(jnp.max(jnp.abs(out - ref)))

    print("KERNEL_OK")
</pallas_src>

<mosaic_0001>
module attributes {stable_mosaic.version = 11 : i64} {
  func.func @kernel(%arg0: i32, %arg1: i32, %arg2: memref<1x128x128xbf16, #tpu.memory_space<vmem>>, %arg3: memref<1x16x128xbf16, #tpu.memory_space<vmem>>, %arg4: memref<1x16x128xbf16, #tpu.memory_space<vmem>>, %arg5: memref<3x128x128xbf16, #tpu.memory_space<vmem>>, %arg6: memref<1x128xf32, #tpu.memory_space<vmem>>, %arg7: memref<1x128x128xbf16, #tpu.memory_space<vmem>>, %arg8: memref<160x128xbf16, #tpu.memory_space<vmem>>) attributes {dimension_semantics = [#tpu.dimension_semantics<parallel>, #tpu.dimension_semantics<parallel>], iteration_bounds = array<i64: 2, 2>, scalar_prefetch = 0 : i64, scratch_operands = 1 : i64, tpu.core_type = #tpu.core_type<tc>, window_params = [{transform_indices = @transform_0, window_bounds = array<i64: 1, 128, 128>}, {transform_indices = @transform_1, window_bounds = array<i64: 1, 16, 128>}, {transform_indices = @transform_2, window_bounds = array<i64: 1, 16, 128>}, {pipeline_mode = #tpu.pipeline_mode<synchronous>, transform_indices = @transform_3, window_bounds = array<i64: 3, 128, 128>}, {pipeline_mode = #tpu.pipeline_mode<synchronous>, transform_indices = @transform_4, window_bounds = array<i64: 1, 128>}, {transform_indices = @transform_5, window_bounds = array<i64: 1, 128, 128>}]} {
    %c0 = arith.constant 0 : index
    %c0_0 = arith.constant 0 : index
    %c0_1 = arith.constant 0 : index
    %0 = vector.load %arg2[%c0, %c0_0, %c0_1] : memref<1x128x128xbf16, #tpu.memory_space<vmem>>, vector<1x128x128xbf16>
    %1 = vector.shape_cast %0 : vector<1x128x128xbf16> to vector<128x128xbf16>
    %c0_2 = arith.constant 0 : index
    %c0_3 = arith.constant 0 : index
    %2 = vector.load %arg8[%c0_2, %c0_3] : memref<160x128xbf16, #tpu.memory_space<vmem>>, vector<128x128xbf16>
    tpu.vector_store %arg8[%c0_2, %c0_3], %1 {strides = array<i32>} : memref<160x128xbf16, #tpu.memory_space<vmem>>, vector<128x128xbf16>,
    %c0_4 = arith.constant 0 : index
    %c0_5 = arith.constant 0 : index
    %c0_6 = arith.constant 0 : index
    %3 = vector.load %arg3[%c0_4, %c0_5, %c0_6] : memref<1x16x128xbf16, #tpu.memory_space<vmem>>, vector<1x16x128xbf16>
    %4 = vector.shape_cast %3 : vector<1x16x128xbf16> to vector<16x128xbf16>
    %c128 = arith.constant 128 : index
    %c0_7 = arith.constant 0 : index
    %5 = vector.load %arg8[%c128, %c0_7] : memref<160x128xbf16, #tpu.memory_space<vmem>>, vector<16x128xbf16>
    tpu.vector_store %arg8[%c128, %c0_7], %4 {strides = array<i32>} : memref<160x128xbf16, #tpu.memory_space<vmem>>, vector<16x128xbf16>,
    %c0_8 = arith.constant 0 : index
    %c0_9 = arith.constant 0 : index
    %c0_10 = arith.constant 0 : index
    %6 = vector.load %arg4[%c0_8, %c0_9, %c0_10] : memref<1x16x128xbf16, #tpu.memory_space<vmem>>, vector<1x16x128xbf16>
    %7 = vector.shape_cast %6 : vector<1x16x128xbf16> to vector<16x128xbf16>
    %c144 = arith.constant 144 : index
    %c0_11 = arith.constant 0 : index
    %8 = vector.load %arg8[%c144, %c0_11] : memref<160x128xbf16, #tpu.memory_space<vmem>>, vector<16x128xbf16>
    tpu.vector_store %arg8[%c144, %c0_11], %7 {strides = array<i32>} : memref<160x128xbf16, #tpu.memory_space<vmem>>, vector<16x128xbf16>,
    %c0_12 = arith.constant 0 : index
    %c0_13 = arith.constant 0 : index
    %9 = vector.load %arg8[%c0_12, %c0_13] : memref<160x128xbf16, #tpu.memory_space<vmem>>, vector<128x128xbf16>
    %c0_14 = arith.constant 0 : index
    %c0_15 = arith.constant 0 : index
    %c0_16 = arith.constant 0 : index
    %10 = vector.load %arg5[%c0_14, %c0_15, %c0_16] : memref<3x128x128xbf16, #tpu.memory_space<vmem>>, vector<1x128x128xbf16>
    %11 = vector.shape_cast %10 : vector<1x128x128xbf16> to vector<128x128xbf16>
    %cst = arith.constant dense<0.000000e+00> : vector<128x128xf32>
    %12 = tpu.matmul %9, %11, %cst {dimension_numbers = #tpu.dot_dimension_numbers<[1], [0], [0], [1], [0, 0, 1, 1], [], []>} : vector<128x128xbf16>, vector<128x128xbf16>, vector<128x128xf32> -> vector<128x128xf32>
    %c16 = arith.constant 16 : index
    %c0_17 = arith.constant 0 : index
    %13 = vector.load %arg8[%c16, %c0_17] : memref<160x128xbf16, #tpu.memory_space<vmem>>, vector<128x128xbf16>
    %c1 = arith.constant 1 : index
    %c0_18 = arith.constant 0 : index
    %c0_19 = arith.constant 0 : index
    %14 = vector.load %arg5[%c1, %c0_18, %c0_19] : memref<3x128x128xbf16, #tpu.memory_space<vmem>>, vector<1x128x128xbf16>
    %15 = vector.shape_cast %14 : vector<1x128x128xbf16> to vector<128x128xbf16>
    %cst_20 = arith.constant dense<0.000000e+00> : vector<128x128xf32>
    %16 = tpu.matmul %13, %15, %cst_20 {dimension_numbers = #tpu.dot_dimension_numbers<[1], [0], [0], [1], [0, 0, 1, 1], [], []>} : vector<128x128xbf16>, vector<128x128xbf16>, vector<128x128xf32> -> vector<128x128xf32>
    %17 = arith.addf %12, %16 : vector<128x128xf32>
    %c32 = arith.constant 32 : index
    %c0_21 = arith.constant 0 : index
    %18 = vector.load %arg8[%c32, %c0_21] : memref<160x128xbf16, #tpu.memory_space<vmem>>, vector<128x128xbf16>
    %c2 = arith.constant 2 : index
    %c0_22 = arith.constant 0 : index
    %c0_23 = arith.constant 0 : index
    %19 = vector.load %arg5[%c2, %c0_22, %c0_23] : memref<3x128x128xbf16, #tpu.memory_space<vmem>>, vector<1x128x128xbf16>
    %20 = vector.shape_cast %19 : vector<1x128x128xbf16> to vector<128x128xbf16>
    %cst_24 = arith.constant dense<0.000000e+00> : vector<128x128xf32>
    %21 = tpu.matmul %18, %20, %cst_24 {dimension_numbers = #tpu.dot_dimension_numbers<[1], [0], [0], [1], [0, 0, 1, 1], [], []>} : vector<128x128xbf16>, vector<128x128xbf16>, vector<128x128xf32> -> vector<128x128xf32>
    %22 = arith.addf %17, %21 : vector<128x128xf32>
    %c0_25 = arith.constant 0 : index
    %c0_26 = arith.constant 0 : index
    %23 = vector.load %arg6[%c0_25, %c0_26] : memref<1x128xf32, #tpu.memory_space<vmem>>, vector<1x128xf32>
    %24 = vector.broadcast %23 : vector<1x128xf32> to vector<128x128xf32>
    %25 = arith.addf %22, %24 : vector<128x128xf32>
    %cst_27 = arith.constant 0.000000e+00 : f32
    %26 = vector.broadcast %cst_27 : f32 to vector<128x128xf32>
    %27 = arith.maximumf %25, %26 : vector<128x128xf32>
    %28 = arith.truncf %27 : vector<128x128xf32> to vector<128x128xbf16>
    %c0_28 = arith.constant 0 : index
    %c0_29 = arith.constant 0 : index
    %c0_30 = arith.constant 0 : index
    %29 = vector.load %arg7[%c0_28, %c0_29, %c0_30] : memref<1x128x128xbf16, #tpu.memory_space<vmem>>, vector<1x128x128xbf16>
    %30 = vector.shape_cast %29 : vector<1x128x128xbf16> to vector<128x128xbf16>
    %31 = vector.shape_cast %28 : vector<128x128xbf16> to vector<1x128x128xbf16>
    tpu.vector_store %arg7[%c0_28, %c0_29, %c0_30], %31 {strides = array<i32>} : memref<1x128x128xbf16, #tpu.memory_space<vmem>>, vector<1x128x128xbf16>,
    return
  }
  func.func @transform_0(%arg0: i32, %arg1: i32) -> (i32, i32, i32) {
    %c0_i32 = arith.constant 0 : i32
    %c0_i32_0 = arith.constant 0 : i32
    return %arg0, %arg1, %c0_i32 : i32, i32, i32
  }
  func.func @transform_1(%arg0: i32, %arg1: i32) -> (i32, i32, i32) {
    %c1_i32 = arith.constant 1 : i32
    %0 = arith.addi %arg1, %c1_i32 : i32
    %c8_i32 = arith.constant 8 : i32
    %1 = arith.muli %0, %c8_i32 : i32
    %c0_i32 = arith.constant 0 : i32
    %c0_i32_0 = arith.constant 0 : i32
    return %arg0, %1, %c0_i32 : i32, i32, i32
  }
  func.func @transform_2(%arg0: i32, %arg1: i32) -> (i32, i32, i32) {
    %c1_i32 = arith.constant 1 : i32
    %0 = arith.addi %arg1, %c1_i32 : i32
    %c8_i32 = arith.constant 8 : i32
    %1 = arith.muli %0, %c8_i32 : i32
    %c1_i32_0 = arith.constant 1 : i32
    %2 = arith.addi %1, %c1_i32_0 : i32
    %c0_i32 = arith.constant 0 : i32
    %c0_i32_1 = arith.constant 0 : i32
    return %arg0, %2, %c0_i32 : i32, i32, i32
  }
  func.func @transform_3(%arg0: i32, %arg1: i32) -> (i32, i32, i32) {
    %c0_i32 = arith.constant 0 : i32
    %c0_i32_0 = arith.constant 0 : i32
    %c0_i32_1 = arith.constant 0 : i32
    %c0_i32_2 = arith.constant 0 : i32
    return %c0_i32, %c0_i32_0, %c0_i32_1 : i32, i32, i32
  }
  func.func @transform_4(%arg0: i32, %arg1: i32) -> (i32, i32) {
    %c0_i32 = arith.constant 0 : i32
    %c0_i32_0 = arith.constant 0 : i32
    %c0_i32_1 = arith.constant 0 : i32
    return %c0_i32, %c0_i32_0 : i32, i32
  }
  func.func @transform_5(%arg0: i32, %arg1: i32) -> (i32, i32, i32) {
    %c0_i32 = arith.constant 0 : i32
    %c0_i32_0 = arith.constant 0 : i32
    return %arg0, %arg1, %c0_i32 : i32, i32, i32
  }
}

module attributes {stable_mosaic.version = 11 : i64} {
  func.func @kernel(%arg0: i32, %arg1: i32, %arg2: memref<1x128x128xbf16, #tpu.memory_space<vmem>>, %arg3: memref<1x16x128xbf16, #tpu.memory_space<vmem>>, %arg4: memref<1x16x128xbf16, #tpu.memory_space<vmem>>, %arg5: memref<3x128x128xbf16, #tpu.memory_space<vmem>>, %arg6: memref<1x128xf32, #tpu.memory_space<vmem>>, %arg7: memref<1x128x128xbf16, #tpu.memory_space<vmem>>, %arg8: memref<1x128x128xf32, #tpu.memory_space<vmem>>, %arg9: memref<160x128xbf16, #tpu.memory_space<vmem>>) attributes {dimension_semantics = [#tpu.dimension_semantics<parallel>, #tpu.dimension_semantics<parallel>], iteration_bounds = array<i64: 2, 2>, scalar_prefetch = 0 : i64, scratch_operands = 1 : i64, tpu.core_type = #tpu.core_type<tc>, window_params = [{transform_indices = @transform_0, window_bounds = array<i64: 1, 128, 128>}, {transform_indices = @transform_1, window_bounds = array<i64: 1, 16, 128>}, {transform_indices = @transform_2, window_bounds = array<i64: 1, 16, 128>}, {pipeline_mode = #tpu.pipeline_mode<synchronous>, transform_indices = @transform_3, window_bounds = array<i64: 3, 128, 128>}, {pipeline_mode = #tpu.pipeline_mode<synchronous>, transform_indices = @transform_4, window_bounds = array<i64: 1, 128>}, {transform_indices = @transform_5, window_bounds = array<i64: 1, 128, 128>}, {transform_indices = @transform_6, window_bounds = array<i64: 1, 128, 128>}]} {
    %c0 = arith.constant 0 : index
    %c0_0 = arith.constant 0 : index
    %c0_1 = arith.constant 0 : index
    %0 = vector.load %arg2[%c0, %c0_0, %c0_1] : memref<1x128x128xbf16, #tpu.memory_space<vmem>>, vector<1x128x128xbf16>
    %1 = vector.shape_cast %0 : vector<1x128x128xbf16> to vector<128x128xbf16>
    %c0_2 = arith.constant 0 : index
    %c0_3 = arith.constant 0 : index
    %2 = vector.load %arg9[%c0_2, %c0_3] : memref<160x128xbf16, #tpu.memory_space<vmem>>, vector<128x128xbf16>
    tpu.vector_store %arg9[%c0_2, %c0_3], %1 {strides = array<i32>} : memref<160x128xbf16, #tpu.memory_space<vmem>>, vector<128x128xbf16>,
    %c0_4 = arith.constant 0 : index
    %c0_5 = arith.constant 0 : index
    %c0_6 = arith.constant 0 : index
    %3 = vector.load %arg3[%c0_4, %c0_5, %c0_6] : memref<1x16x128xbf16, #tpu.memory_space<vmem>>, vector<1x16x128xbf16>
    %4 = vector.shape_cast %3 : vector<1x16x128xbf16> to vector<16x128xbf16>
    %c128 = arith.constant 128 : index
    %c0_7 = arith.constant 0 : index
    %5 = vector.load %arg9[%c128, %c0_7] : memref<160x128xbf16, #tpu.memory_space<vmem>>, vector<16x128xbf16>
    tpu.vector_store %arg9[%c128, %c0_7], %4 {strides = array<i32>} : memref<160x128xbf16, #tpu.memory_space<vmem>>, vector<16x128xbf16>,
    %c0_8 = arith.constant 0 : index
    %c0_9 = arith.constant 0 : index
    %c0_10 = arith.constant 0 : index
    %6 = vector.load %arg4[%c0_8, %c0_9, %c0_10] : memref<1x16x128xbf16, #tpu.memory_space<vmem>>, vector<1x16x128xbf16>
    %7 = vector.shape_cast %6 : vector<1x16x128xbf16> to vector<16x128xbf16>
    %c144 = arith.constant 144 : index
    %c0_11 = arith.constant 0 : index
    %8 = vector.load %arg9[%c144, %c0_11] : memref<160x128xbf16, #tpu.memory_space<vmem>>, vector<16x128xbf16>
    tpu.vector_store %arg9[%c144, %c0_11], %7 {strides = array<i32>} : memref<160x128xbf16, #tpu.memory_space<vmem>>, vector<16x128xbf16>,
    %c0_12 = arith.constant 0 : index
    %c0_13 = arith.constant 0 : index
    %9 = vector.load %arg9[%c0_12, %c0_13] : memref<160x128xbf16, #tpu.memory_space<vmem>>, vector<128x128xbf16>
    %c0_14 = arith.constant 0 : index
    %c0_15 = arith.constant 0 : index
    %c0_16 = arith.constant 0 : index
    %10 = vector.load %arg5[%c0_14, %c0_15, %c0_16] : memref<3x128x128xbf16, #tpu.memory_space<vmem>>, vector<1x128x128xbf16>
    %11 = vector.shape_cast %10 : vector<1x128x128xbf16> to vector<128x128xbf16>
    %cst = arith.constant dense<0.000000e+00> : vector<128x128xf32>
    %12 = tpu.matmul %9, %11, %cst {dimension_numbers = #tpu.dot_dimension_numbers<[1], [0], [0], [1], [0, 0, 1, 1], [], []>} : vector<128x128xbf16>, vector<128x128xbf16>, vector<128x128xf32> -> vector<128x128xf32>
    %c16 = arith.constant 16 : index
    %c0_17 = arith.constant 0 : index
    %13 = vector.load %arg9[%c16, %c0_17] : memref<160x128xbf16, #tpu.memory_space<vmem>>, vector<128x128xbf16>
    %c1 = arith.constant 1 : index
    %c0_18 = arith.constant 0 : index
    %c0_19 = arith.constant 0 : index
    %14 = vector.load %arg5[%c1, %c0_18, %c0_19] : memref<3x128x128xbf16, #tpu.memory_space<vmem>>, vector<1x128x128xbf16>
    %15 = vector.shape_cast %14 : vector<1x128x128xbf16> to vector<128x128xbf16>
    %cst_20 = arith.constant dense<0.000000e+00> : vector<128x128xf32>
    %16 = tpu.matmul %13, %15, %cst_20 {dimension_numbers = #tpu.dot_dimension_numbers<[1], [0], [0], [1], [0, 0, 1, 1], [], []>} : vector<128x128xbf16>, vector<128x128xbf16>, vector<128x128xf32> -> vector<128x128xf32>
    %17 = arith.addf %12, %16 : vector<128x128xf32>
    %c32 = arith.constant 32 : index
    %c0_21 = arith.constant 0 : index
    %18 = vector.load %arg9[%c32, %c0_21] : memref<160x128xbf16, #tpu.memory_space<vmem>>, vector<128x128xbf16>
    %c2 = arith.constant 2 : index
    %c0_22 = arith.constant 0 : index
    %c0_23 = arith.constant 0 : index
    %19 = vector.load %arg5[%c2, %c0_22, %c0_23] : memref<3x128x128xbf16, #tpu.memory_space<vmem>>, vector<1x128x128xbf16>
    %20 = vector.shape_cast %19 : vector<1x128x128xbf16> to vector<128x128xbf16>
    %cst_24 = arith.constant dense<0.000000e+00> : vector<128x128xf32>
    %21 = tpu.matmul %18, %20, %cst_24 {dimension_numbers = #tpu.dot_dimension_numbers<[1], [0], [0], [1], [0, 0, 1, 1], [], []>} : vector<128x128xbf16>, vector<128x128xbf16>, vector<128x128xf32> -> vector<128x128xf32>
    %22 = arith.addf %17, %21 : vector<128x128xf32>
    %c0_25 = arith.constant 0 : index
    %c0_26 = arith.constant 0 : index
    %23 = vector.load %arg6[%c0_25, %c0_26] : memref<1x128xf32, #tpu.memory_space<vmem>>, vector<1x128xf32>
    %24 = vector.broadcast %23 : vector<1x128xf32> to vector<128x128xf32>
    %25 = arith.addf %22, %24 : vector<128x128xf32>
    %c0_27 = arith.constant 0 : index
    %c0_28 = arith.constant 0 : index
    %c0_29 = arith.constant 0 : index
    %26 = vector.load %arg7[%c0_27, %c0_28, %c0_29] : memref<1x128x128xbf16, #tpu.memory_space<vmem>>, vector<1x128x128xbf16>
    %27 = vector.shape_cast %26 : vector<1x128x128xbf16> to vector<128x128xbf16>
    %28 = arith.extf %27 : vector<128x128xbf16> to vector<128x128xf32>
    %29 = arith.addf %25, %28 : vector<128x128xf32>
    %cst_30 = arith.constant 0.000000e+00 : f32
    %30 = vector.broadcast %cst_30 : f32 to vector<128x128xf32>
    %31 = arith.maximumf %29, %30 : vector<128x128xf32>
    %c0_31 = arith.constant 0 : index
    %c0_32 = arith.constant 0 : index
    %c0_33 = arith.constant 0 : index
    %32 = vector.load %arg8[%c0_31, %c0_32, %c0_33] : memref<1x128x128xf32, #tpu.memory_space<vmem>>, vector<1x128x128xf32>
    %33 = vector.shape_cast %32 : vector<1x128x128xf32> to vector<128x128xf32>
    %34 = vector.shape_cast %31 : vector<128x128xf32> to vector<1x128x128xf32>
    tpu.vector_store %arg8[%c0_31, %c0_32, %c0_33], %34 {strides = array<i32>} : memref<1x128x128xf32, #tpu.memory_space<vmem>>, vector<1x128x128xf32>,
    return
  }
  func.func @transform_0(%arg0: i32, %arg1: i32) -> (i32, i32, i32) {
    %c0_i32 = arith.constant 0 : i32
    %c0_i32_0 = arith.constant 0 : i32
    return %arg0, %arg1, %c0_i32 : i32, i32, i32
  }
  func.func @transform_1(%arg0: i32, %arg1: i32) -> (i32, i32, i32) {
    %c1_i32 = arith.constant 1 : i32
    %0 = arith.addi %arg1, %c1_i32 : i32
    %c8_i32 = arith.constant 8 : i32
    %1 = arith.muli %0, %c8_i32 : i32
    %c0_i32 = arith.constant 0 : i32
    %c0_i32_0 = arith.constant 0 : i32
    return %arg0, %1, %c0_i32 : i32, i32, i32
  }
  func.func @transform_2(%arg0: i32, %arg1: i32) -> (i32, i32, i32) {
    %c1_i32 = arith.constant 1 : i32
    %0 = arith.addi %arg1, %c1_i32 : i32
    %c8_i32 = arith.constant 8 : i32
    %1 = arith.muli %0, %c8_i32 : i32
    %c1_i32_0 = arith.constant 1 : i32
    %2 = arith.addi %1, %c1_i32_0 : i32
    %c0_i32 = arith.constant 0 : i32
    %c0_i32_1 = arith.constant 0 : i32
    return %arg0, %2, %c0_i32 : i32, i32, i32
  }
  func.func @transform_3(%arg0: i32, %arg1: i32) -> (i32, i32, i32) {
    %c0_i32 = arith.constant 0 : i32
    %c0_i32_0 = arith.constant 0 : i32
    %c0_i32_1 = arith.constant 0 : i32
    %c0_i32_2 = arith.constant 0 : i32
    return %c0_i32, %c0_i32_0, %c0_i32_1 : i32, i32, i32
  }
  func.func @transform_4(%arg0: i32, %arg1: i32) -> (i32, i32) {
    %c0_i32 = arith.constant 0 : i32
    %c0_i32_0 = arith.constant 0 : i32
    %c0_i32_1 = arith.constant 0 : i32
    return %c0_i32, %c0_i32_0 : i32, i32
  }
  func.func @transform_5(%arg0: i32, %arg1: i32) -> (i32, i32, i32) {
    %c0_i32 = arith.constant 0 : i32
    %c0_i32_0 = arith.constant 0 : i32
    return %arg0, %arg1, %c0_i32 : i32, i32, i32
  }
  func.func @transform_6(%arg0: i32, %arg1: i32) -> (i32, i32, i32) {
    %c0_i32 = arith.constant 0 : i32
    %c0_i32_0 = arith.constant 0 : i32
    return %arg0, %arg1, %c0_i32 : i32, i32, i32
  }
}

</mosaic_0001>

<bundles_post_ra>
// kernel: basic_block_forward.2
= control target key start
LH: loop header
LB: loop body
LE: loop exit
PB: predicated region body
PF: predicated region fallthrough
CT: control target
= control target key end

     0   :  { %s1770_s18 = smov 0   ;;  %s1772_s19 = smov 0   ;;  %s1987_s0 = inlined_call_operand.vmem [shape: bf16[2,288,128], index: 0, kind: input, shape index: {}, may-alias: {0,1,2}]   ;;  %s1988_s1 = inlined_call_operand.vmem [shape: bf16[2,288,128], index: 1, kind: input, shape index: {}, may-alias: {0,1,2}]   ;;  %s1989_s2 = inlined_call_operand.vmem [shape: bf16[2,288,128], index: 2, kind: input, shape index: {}, may-alias: {0,1,2}]   ;;  %s1990_s3 = inlined_call_operand.vmem [shape: bf16[3,128,128], index: 3, kind: input, shape index: {}]   ;;  %s1991_s4 = inlined_call_operand.vmem [shape: f32[1,128], index: 4, kind: input, shape index: {}]   ;;  %s1992_s5 = inlined_call_operand.vmem [shape: bf16[2,256,128], index: 5, kind: output, shape index: {}]  }
   0x1   :  { %s1774_s20 = smov 0   ;;  %s1776_s21 = smov 0  }
   0x2   :  { %s1778_s22 = smov 0  }
   0x3 LB: > { %s24_s23 = sadd.s32 1, %s1730_s20  ;;  %s27_s24 = sadd.s32 1, %s1734_s21  ;;  %s1738_s22 = sphi %s1778_s22, %s15_s22   ;;  %s1734_s21 = sphi %s1776_s21, %s1996_s21   ;;  %s1730_s20 = sphi %s1774_s20, %s1995_s20   ;;  %s1726_s19 = sphi %s1772_s19, %s1994_s19   ;;  %s1722_s18 = sphi %s1770_s18, %s1993_s18  }
   0x4   : > { %p25_p0 = scmp.ge.s32.totalorder %s24_s23, 2  ;;  %p1253_p1 = scmp.ge.s32.totalorder %s1738_s22, 1 }
   0x5   : > { %p270_p2 = scmp.lt.s32.totalorder %s1738_s22, 5 }
   0x6   : > { %s1998_s23 = smov (%p25_p0, %s24_s23), 0  ;;  %s2000_s24 = smov (!%p25_p0, %s27_s24), %s1734_s21 }
   0x7   : > { %p271_p3 = pnand %p1253_p1, %p270_p2  ;;  %p29_p4 = scmp.ge.s32.totalorder %s2000_s24, 2 }
   0x8   : > { %v1666_v0 = vld [vmem:[%s1990_s3 + $0x40] sm:$0xff] (!%p271_p3)   ;;  %s1803_s27 = sshll.u32 (!%p271_p3), %s1722_s18, 4  ;;  %p338_p5 = scmp.lt.s32.totalorder (!%p271_p3), %s1726_s19, 1  ;;  %v1668_v2 = vld [vmem:[%s1990_s3 + $0x48] sm:$0xff] (!%p271_p3)   ;;  %v1670_v4 = vld [vmem:[%s1990_s3 + $0x50] sm:$0xff] (!%p271_p3)  }
   0x9   : > { %s2002_s24 = smov (%p29_p4, %s2000_s24), 0  ;;  %274 = sbr.rel (%p271_p3) target bundleno = 307 (0x133), region = 40 }
   0xa   : > { %v1667_v1 = vld [vmem:[%s1990_s3] sm:$0xff] (!%p271_p3)   ;;  %1481 = vmatprep.subr.bf16.mxu1 (!%p271_p3), %v1666_v0  ;;  %p340_p6 = scmp.lt.s32.totalorder (!%p271_p3), %s1803_s27, 35  ;;  %v1669_v3 = vld [vmem:[%s1990_s3 + $0x8] sm:$0xff] (!%p271_p3)   ;;  %v1671_v5 = vld [vmem:[%s1990_s3 + $0x10] sm:$0xff] (!%p271_p3)   ;;  %s1422_s28 = sadd.s32 (!%p271_p3), 16, %s1803_s27 }
   0xb   : > { %1513 = vmatprep.subr.bf16.mxu0 (!%p271_p3), %v1667_v1  ;;  %1482 = vmatpush3.bf16.msra.mxu1 (!%p271_p3), %v1666_v0  ;;  %v1672_v6 = vld [vmem:[%s1990_s3 + $0x58] sm:$0xff] (!%p271_p3)   ;;  %v1674_v8 = vld [vmem:[%s1990_s3 + $0x60] sm:$0xff] (!%p271_p3)   ;;  %v1676_v10 = vld [vmem:[%s1990_s3 + $0x68] sm:$0xff] (!%p271_p3)   ;;  %p356_p7 = scmp.lt.s32.totalorder (!%p271_p3), %s1422_s28, 35  ;;  %s1364_s16 = sadd.s32 (!%p271_p3), 2, %s1422_s28 }
   0xc   : > { %1514 = vmatpush3.bf16.msra.mxu0 (!%p271_p3), %v1667_v1  ;;  %1483 = vmatprep.subr.bf16.mxu1 (!%p271_p3), %v1668_v2  ;;  %v1673_v7 = vld [vmem:[%s1990_s3 + $0x18] sm:$0xff] (!%p271_p3)   ;;  %v1675_v9 = vld [vmem:[%s1990_s3 + $0x20] sm:$0xff] (!%p271_p3)   ;;  %v1677_v11 = vld [vmem:[%s1990_s3 + $0x28] sm:$0xff] (!%p271_p3)   ;;  %p371_p8 = scmp.lt.s32.totalorder (!%p271_p3), %s1364_s16, 35  ;;  %p384_p9 = scmp.lt.s32.totalorder (!%p271_p3), %s1803_s27, 31 }
   0xd   : > { %1515 = vmatprep.subr.bf16.mxu0 (!%p271_p3), %v1669_v3  ;;  %v1678_v14 = vld [vmem:[%s1990_s3 + $0x70] sm:$0xff] (!%p271_p3)   ;;  %v1680_v16 = vld [vmem:[%s1990_s3 + $0x78] sm:$0xff] (!%p271_p3)   ;;  %v1685_v18 = vld [vmem:[%s1990_s3 + $0x80] sm:$0xff] (!%p271_p3)  }
   0xe   : > { %v1679_v15 = vld [vmem:[%s1990_s3 + $0x30] sm:$0xff] (!%p271_p3)   ;;  %v1681_v17 = vld [vmem:[%s1990_s3 + $0x38] sm:$0xff] (!%p271_p3)   ;;  %v1686_v20 = vld [vmem:[%s1990_s3 + $0x88] sm:$0xff] (!%p271_p3)  }
   0xf   : > { %1484 = vmatpush3.bf16.msra.mxu1 (!%p271_p3), %v1668_v2  ;;  %v1689_v22 = vld [vmem:[%s1990_s3 + $0x90] sm:$0xff] (!%p271_p3)   ;;  %v1690_v24 = vld [vmem:[%s1990_s3 + $0x98] sm:$0xff] (!%p271_p3)   ;;  %v1693_v26 = vld [vmem:[%s1990_s3 + $0xa0] sm:$0xff] (!%p271_p3)  }
  0x10   : > { %s2004_s19 = smov (!%p338_p5, %s1726_s19), 1  ;;  %1516 = vmatpush3.bf16.msra.mxu0 %v1669_v3  ;;  %1485 = vmatprep.subr.bf16.mxu1 %v1670_v4  ;;  %s2006_s28 = smov (!%p356_p7, %s1422_s28), 35  ;;  %v1694_v28 = vld [vmem:[%s1990_s3 + $0xa8] sm:$0xff]   ;;  %v1697_v30 = vld [vmem:[%s1990_s3 + $0xb0] sm:$0xff]   ;;  %v1698_v32 = vld [vmem:[%s1990_s3 + $0xb8] sm:$0xff]  }
  0x11   : > { %s341_s11 = scalar_select %p340_p6, %s1803_s27, 35  ;;  %1517 = vmatprep.subr.bf16.mxu0 %v1671_v5  ;;  %v1936_v2 = vld [vmem:[%s1991_s4] ss:$0 sm:$0xff] }
  0x12   : > { %s1825_s14 = smul.u32 36, %s2004_s19  ;;  %s2008_s16 = smov (!%p371_p8, %s1364_s16), 35 }
  0x13   : > { %1486 = vmatpush3.bf16.msra.mxu1 %v1670_v4  ;;  %s2010_s27 = smov (!%p384_p9, %s1803_s27), 31 }
  0x14   : > { %s343_s15 = sadd.s32 %s1825_s14, %s341_s11  ;;  %1518 = vmatpush3.bf16.msra.mxu0 %v1671_v5  ;;  %1487 = vmatprep.subr.bf16.mxu1 %v1672_v6  ;;  %s359_s29 = sadd.s32 %s1825_s14, %s2006_s28 }
  0x15   : > { %s1255_s26 = sshll.u32 %s343_s15, 2  ;;  %1519 = vmatprep.subr.bf16.mxu0 %v1673_v7  ;;  %s1867_s9 = sshll.u32 %s359_s29, 2 }
  0x16   : > { %s1844_s10 = scalar_lea.vmem %s1987_s0, %s1255_s26  ;;  %s374_s11 = sadd.s32 %s1825_s14, %s2008_s16 }
  0x17   : > { %1488 = vmatpush3.bf16.msra.mxu1 %v1672_v6  ;;  %v1682_v12 = vld [vmem:[%s1844_s10 + $0x8] sm:$0xff]   ;;  %v1683_v13 = vld [vmem:[%s1844_s10] sm:$0xff]   ;;  %s361_s17 = scalar_lea.vmem %s1988_s1, %s1867_s9  ;;  %s1877_s18 = sshll.u32 %s374_s11, 2  ;;  %v1684_v19 = vld [vmem:[%s1844_s10 + $0x10] sm:$0xff]  }
  0x18   : > { %1520 = vmatpush3.bf16.msra.mxu0 %v1673_v7  ;;  %1489 = vmatprep.subr.bf16.mxu1 %v1674_v8  ;;  %s376_s29 = scalar_lea.vmem %s1989_s2, %s1877_s18  ;;  %v1687_v21 = vld [vmem:[%s1844_s10 + $0x18] sm:$0xff]   ;;  %v1688_v23 = vld [vmem:[%s1844_s10 + $0x20] sm:$0xff]   ;;  %v1691_v25 = vld [vmem:[%s1844_s10 + $0x28] sm:$0xff]   ;;  %s1263_s18 = sshll.u32 %s2004_s19, 5 }
  0x19   : > { %1521 = vmatprep.subr.bf16.mxu0 %v1675_v9  ;;  %1497 = vmatprep.mubr.bf16.mxu1 %v1682_v12  ;;  %v1692_v27 = vld [vmem:[%s1844_s10 + $0x30] sm:$0xff]   ;;  %v1695_v29 = vld [vmem:[%s1844_s10 + $0x38] sm:$0xff]   ;;  %v1696_v31 = vld [vmem:[%s361_s17] sm:$0xff]   ;;  %s387_s6 = sadd.s32 %s1263_s18, %s2010_s27 }
  0x1a   : > { %1529 = vmatprep.mubr.bf16.mxu0 %v1683_v13  ;;  %v1699_v33 = vld [vmem:[%s376_s29] sm:$0xff]   ;;  %s1264_s19 = sshll.u32 %s387_s6, 2 }
  0x1b   : > { %1490 = vmatpush3.bf16.msra.mxu1 %v1674_v8  ;;  %s1949_s8 = scalar_lea.vmem %s1992_s5, %s1264_s19 }
  0x1c   : > { %1522 = vmatpush3.bf16.msra.mxu0 %v1675_v9  ;;  %1491 = vmatprep.subr.bf16.mxu1 %v1676_v10 }
  0x1d   : > { %1523 = vmatprep.subr.bf16.mxu0 %v1677_v11 }
  0x1f   : > { %1492 = vmatpush3.bf16.msra.mxu1 %v1676_v10 }
  0x20   : > { %1524 = vmatpush3.bf16.msra.mxu0 %v1677_v11  ;;  %1493 = vmatprep.subr.bf16.mxu1 %v1678_v14 }
  0x21   : > { %1525 = vmatprep.subr.bf16.mxu0 %v1679_v15 }
  0x23   : > { %1494 = vmatpush3.bf16.msra.mxu1 %v1678_v14 }
  0x24   : > { %1526 = vmatpush3.bf16.msra.mxu0 %v1679_v15  ;;  %1495 = vmatprep.subr.bf16.mxu1 %v1680_v16 }
  0x25   : > { %1527 = vmatprep.subr.bf16.mxu0 %v1681_v17 }
  0x27   : > { %1496 = vmatpush3.bf16.msra.mxu1 %v1680_v16 }
  0x28   : > { %1528 = vmatpush3.bf16.msra.mxu0 %v1681_v17  ;;  %1577 = vmatprep.subr.bf16.mxu1 %v1685_v18 }
  0x29   : > { %1545 = vmatprep.subr.bf16.mxu0 %v1685_v18 }
  0x2a   : > { %1498 = vmatmul.mubr.bf16.vlgmr.msra.gmra.mrb[0].mxu1 %v1684_v19 }
  0x2b   : > { %1530 = vmatmul.mubr.bf16.vlgmr.msra.gmra.mrb[0].mxu0 %v1682_v12  ;;  %1585 = vmatpush3.bf16.msra.mxu1 %v1685_v18 }
  0x2c   : > { %1546 = vmatpush3.bf16.msra.mxu0 %v1685_v18  ;;  %1578 = vmatprep.subr.bf16.mxu1 %v1686_v20 }
  0x2d   : > { %1547 = vmatprep.subr.bf16.mxu0 %v1686_v20  ;;  %1501 = vmatprep.mubr.bf16.mxu1 %v1687_v21 }
  0x2e   : > { %1533 = vmatprep.mubr.bf16.mxu0 %v1684_v19 }
  0x2f   : > { %1586 = vmatpush3.bf16.msra.mxu1 %v1686_v20 }
  0x30   : > { %1548 = vmatpush3.bf16.msra.mxu0 %v1686_v20  ;;  %1579 = vmatprep.subr.bf16.mxu1 %v1689_v22 }
  0x31   : > { %1549 = vmatprep.subr.bf16.mxu0 %v1689_v22 }
  0x32   : > { %1502 = vmatmul.mubr.bf16.gmra.mrb[4].mxu1 %v1688_v23 }
  0x33   : > { %1534 = vmatmul.mubr.bf16.gmra.mrb[4].mxu0 %v1687_v21  ;;  %1587 = vmatpush3.bf16.msra.mxu1 %v1689_v22 }
  0x34   : > { %1550 = vmatpush3.bf16.msra.mxu0 %v1689_v22  ;;  %1580 = vmatprep.subr.bf16.mxu1 %v1690_v24 }
  0x35   : > { %1551 = vmatprep.subr.bf16.mxu0 %v1690_v24  ;;  %1505 = vmatprep.mubr.bf16.mxu1 %v1691_v25 }
  0x36   : > { %1537 = vmatprep.mubr.bf16.mxu0 %v1688_v23 }
  0x37   : > { %1588 = vmatpush3.bf16.msra.mxu1 %v1690_v24 }
  0x38   : > { %1552 = vmatpush3.bf16.msra.mxu0 %v1690_v24  ;;  %1581 = vmatprep.subr.bf16.mxu1 %v1693_v26 }
  0x39   : > { %1553 = vmatprep.subr.bf16.mxu0 %v1693_v26 }
  0x3a   : > { %1506 = vmatmul.mubr.bf16.gmra.mrb[8].mxu1 %v1692_v27 }
  0x3b   : > { %1538 = vmatmul.mubr.bf16.gmra.mrb[8].mxu0 %v1691_v25  ;;  %1589 = vmatpush3.bf16.msra.mxu1 %v1693_v26 }
  0x3c   : > { %1554 = vmatpush3.bf16.msra.mxu0 %v1693_v26  ;;  %1582 = vmatprep.subr.bf16.mxu1 %v1694_v28 }
  0x3d   : > { %1555 = vmatprep.subr.bf16.mxu0 %v1694_v28  ;;  %1509 = vmatprep.mubr.bf16.mxu1 %v1695_v29 }
  0x3e   : > { %1541 = vmatprep.mubr.bf16.mxu0 %v1692_v27 }
  0x3f   : > { %1590 = vmatpush3.bf16.msra.mxu1 %v1694_v28 }
  0x40   : > { %1556 = vmatpush3.bf16.msra.mxu0 %v1694_v28  ;;  %1583 = vmatprep.subr.bf16.mxu1 %v1697_v30 }
  0x41   : > { %1557 = vmatprep.subr.bf16.mxu0 %v1697_v30 }
  0x42   : > { %1510 = vmatmul.mubr.bf16.gmra.mrb[12].mxu1 %v1696_v31 }
  0x43   : > { %1542 = vmatmul.mubr.bf16.gmra.mrb[12].mxu0 %v1695_v29  ;;  %1591 = vmatpush3.bf16.msra.mxu1 %v1697_v30 }
  0x44   : > { %1558 = vmatpush3.bf16.msra.mxu0 %v1697_v30  ;;  %1584 = vmatprep.subr.bf16.mxu1 %v1698_v32 }
  0x45   : > { %1559 = vmatprep.subr.bf16.mxu0 %v1698_v32  ;;  %1561 = vmatprep.mubr.bf16.mxu0 %v1684_v19 }
  0x46   : > { %1569 = vmatprep.mubr.bf16.mxu1 %v1692_v27 }
  0x47   : > { %1592 = vmatpush3.bf16.msra.mxu1 %v1698_v32 }
  0x48   : > { %1560 = vmatpush3.bf16.msra.mxu0 %v1698_v32 }
  0x4a   : > { %1570 = vmatmul.mubr.bf16.vlgmr.msra.gmra.mrb[16].mxu1 %v1695_v29 }
  0x4b   : > { %1562 = vmatmul.mubr.bf16.vlgmr.msra.gmra.mrb[0].mxu0 %v1687_v21  ;;  %1573 = vmatprep.mubr.bf16.mxu1 %v1696_v31 }
  0x4c   : > { %1565 = vmatprep.mubr.bf16.mxu0 %v1688_v23 }
  0x52   : > { %1574 = vmatmul.mubr.bf16.gmra.mrb[20].mxu1 %v1699_v33 }
  0x53   : > { %1566 = vmatmul.mubr.bf16.gmra.mrb[4].mxu0 %v1691_v25 }
  0xfd   : > { %v1499_v34 = vpop.f32.mrb[0].mxu1 }
  0xfe   : > { %v606_v35 = vpop.f32.mrb[1].mxu1 }
  0xff   : > { %v1500_v36 = vpop.f32.mrb[2].mxu1 }
 0x100   : > { %v609_v37 = vpop.f32.mrb[3].mxu1 }
 0x105   : > { %v1920_v38 = vpop.f32.mrb[4].mxu1 }
 0x106   : > { %v1922_v39 = vpop.f32.mrb[5].mxu1 }
 0x107   : > { %v1924_v40 = vpop.f32.mrb[6].mxu1 }
 0x108   : > { %v1926_v41 = vpop.f32.mrb[7].mxu1 }
 0x10d   : > { %v1507_v42 = vpop.f32.mrb[8].mxu1 }
 0x10e   : > { %v1539_v43 = vpop.f32.mrb[8].mxu0  ;;  %v638_v44 = vpop.f32.mrb[9].mxu1 }
 0x10f   : > { %v792_v45 = vadd.f32 %v1539_v43, %v1507_v42  ;;  %v783_v46 = vpop.f32.mrb[9].mxu0  ;;  %v1508_v47 = vpop.f32.mrb[10].mxu1 }
 0x110   : > { %v784_v48 = vadd.f32 %v783_v46, %v638_v44  ;;  %v1540_v49 = vpop.f32.mrb[10].mxu0  ;;  %v641_v50 = vpop.f32.mrb[11].mxu1 }
 0x111   : > { %v795_v51 = vadd.f32 %v1540_v49, %v1508_v47  ;;  %v786_v52 = vpop.f32.mrb[11].mxu0 }
 0x112   : > { %v787_v53 = vadd.f32 %v786_v52, %v641_v50 }
 0x115   : > { %v1511_v54 = vpop.f32.mrb[12].mxu1 }
 0x116   : > { %v1543_v55 = vpop.f32.mrb[12].mxu0  ;;  %v654_v56 = vpop.f32.mrb[13].mxu1 }
 0x117   : > { %v808_v57 = vadd.f32 %v1543_v55, %v1511_v54  ;;  %v799_v58 = vpop.f32.mrb[13].mxu0  ;;  %v1512_v59 = vpop.f32.mrb[14].mxu1 }
 0x118   : > { %v800_v60 = vadd.f32 %v799_v58, %v654_v56  ;;  %v1544_v61 = vpop.f32.mrb[14].mxu0  ;;  %v657_v62 = vpop.f32.mrb[15].mxu1 }
 0x119   : > { %v811_v63 = vadd.f32 %v1544_v61, %v1512_v59  ;;  %v802_v0 = vpop.f32.mrb[15].mxu0 }
 0x11a   : > { %v1929_v1 = vadd.f32 %v802_v0, %v657_v62 }
 0x11d   : > { %v1571_v3 = vpop.f32.mrb[16].mxu1 }
 0x11e   : > { %v1563_v4 = vpop.f32.mrb[0].mxu0  ;;  %v994_v5 = vadd.f32 %v1571_v3, %v792_v45  ;;  %v953_v6 = vpop.f32.mrb[17].mxu1 }
 0x11f   : > { %v1593_v7 = vadd.f32 %v1563_v4, %v1499_v34  ;;  %v921_v8 = vpop.f32.mrb[1].mxu0  ;;  %v992_v9 = vadd.f32 %v953_v6, %v784_v48  ;;  %v1572_v10 = vpop.f32.mrb[18].mxu1 }
 0x120   : > { %v1017_v11 = vadd.f32 %v1936_v2, %v994_v5  ;;  %v1594_v12 = vadd.f32 %v921_v8, %v606_v35  ;;  %v1564_v13 = vpop.f32.mrb[2].mxu0  ;;  %v995_v14 = vadd.f32 %v1572_v10, %v795_v51  ;;  %v956_v15 = vpop.f32.mrb[19].mxu1 }
 0x121   : > { %v1009_v16 = vadd.f32 %v1593_v7, %v1936_v2  ;;  %v1015_v17 = vadd.f32 %v1936_v2, %v992_v9  ;;  %v1595_v18 = vadd.f32 %v1564_v13, %v1500_v36  ;;  %v924_v19 = vpop.f32.mrb[3].mxu0  ;;  %v993_v20 = vadd.f32 %v956_v15, %v787_v53 }
 0x122   : > { %v1007_v21 = vadd.f32 %v1594_v12, %v1936_v2  ;;  %v1018_v22 = vadd.f32 %v1936_v2, %v995_v14  ;;  %v1596_v23 = vadd.f32 %v924_v19, %v609_v37  ;;  %v1033_v26 = vmax.f32 %v1017_v11, 0.0 }
 0x123   : > { %v1010_v24 = vadd.f32 %v1595_v18, %v1936_v2  ;;  %v1016_v25 = vadd.f32 %v1936_v2, %v993_v20  ;;  %v1025_v29 = vmax.f32 %v1009_v16, 0.0  ;;  %v1031_v30 = vmax.f32 %v1015_v17, 0.0 }
 0x124   : > { %v1034_v27 = vmax.f32 %v1018_v22, 0.0  ;;  %v1008_v28 = vadd.f32 %v1596_v23, %v1936_v2  ;;  %v1023_v34 = vmax.f32 %v1007_v21, 0.0 }
 0x125   : > { %v1026_v31 = vmax.f32 %v1010_v24, 0.0  ;;  %v1032_v32 = vmax.f32 %v1016_v25, 0.0  ;;  %v1575_v33 = vpop.f32.mrb[20].mxu1 }
 0x126   : > { %v1409_v35 = vpack.c.bf16 %v1034_v27, %v1033_v26  ;;  %v1024_v36 = vmax.f32 %v1008_v28, 0.0  ;;  %v1567_v37 = vpop.f32.mrb[4].mxu0  ;;  %v998_v42 = vadd.f32 %v1575_v33, %v808_v57  ;;  %v969_v43 = vpop.f32.mrb[21].mxu1 }
 0x127   : > { %v1389_v44 = vpack.c.bf16 %v1026_v31, %v1025_v29  ;;  %v1404_v45 = vpack.c.bf16 %v1032_v32, %v1031_v30  ;;  %v1597_v46 = vadd.f32 %v1567_v37, %v1920_v38  ;;  %v937_v47 = vpop.f32.mrb[5].mxu0  ;;  %v996_v48 = vadd.f32 %v969_v43, %v800_v60  ;;  %v1576_v49 = vpop.f32.mrb[22].mxu1 }
 0x128   : > { %1429 = vst [vmem:[%s1949_s8 + $0x28] sm:$0xff] %v1409_v35   ;;  %v1384_v50 = vpack.c.bf16 %v1024_v36, %v1023_v34  ;;  %v1021_v51 = vadd.f32 %v1936_v2, %v998_v42  ;;  %v1598_v52 = vadd.f32 %v937_v47, %v1922_v39  ;;  %v1568_v53 = vpop.f32.mrb[6].mxu0  ;;  %v999_v54 = vadd.f32 %v1576_v49, %v811_v63  ;;  %v972_v55 = vpop.f32.mrb[23].mxu1 }
 0x129   : > { %1425 = vst [vmem:[%s1949_s8 + $0x8] sm:$0xff] %v1389_v44   ;;  %1428 = vst [vmem:[%s1949_s8 + $0x20] sm:$0xff] %v1404_v45   ;;  %v1013_v56 = vadd.f32 %v1597_v46, %v1936_v2  ;;  %v1019_v57 = vadd.f32 %v1936_v2, %v996_v48  ;;  %v1599_v38 = vadd.f32 %v1568_v53, %v1924_v40  ;;  %v940_v58 = vpop.f32.mrb[7].mxu0 }
 0x12a   : > { %v997_v59 = vadd.f32 %v972_v55, %v1929_v1  ;;  %1385 = vst [vmem:[%s1949_s8] sm:$0xff] %v1384_v50   ;;  %v1011_v60 = vadd.f32 %v1598_v52, %v1936_v2  ;;  %v1022_v61 = vadd.f32 %v1936_v2, %v999_v54  ;;  %v1600_v39 = vadd.f32 %v940_v58, %v1926_v41 }
 0x12b   : > { %v1014_v62 = vadd.f32 %v1599_v38, %v1936_v2  ;;  %v1037_v0 = vmax.f32 %v1021_v51, 0.0  ;;  %v1029_v1 = vmax.f32 %v1013_v56, 0.0  ;;  %v1035_v4 = vmax.f32 %v1019_v57, 0.0 }
 0x12c   : > { %v1020_v63 = vadd.f32 %v1936_v2, %v997_v59  ;;  %v1038_v40 = vmax.f32 %v1022_v61, 0.0  ;;  %v1012_v3 = vadd.f32 %v1600_v39, %v1936_v2  ;;  %v1027_v7 = vmax.f32 %v1011_v60, 0.0 }
 0x12d   : > { %v1030_v5 = vmax.f32 %v1014_v62, 0.0 }
 0x12e   : > { %v1036_v6 = vmax.f32 %v1020_v63, 0.0  ;;  %v1419_v8 = vpack.c.bf16 %v1038_v40, %v1037_v0  ;;  %v1028_v9 = vmax.f32 %v1012_v3, 0.0 }
 0x12f   : > { %v1399_v10 = vpack.c.bf16 %v1030_v5, %v1029_v1 }
 0x130   : > { %v1414_v41 = vpack.c.bf16 %v1036_v6, %v1035_v4  ;;  %1431 = vst [vmem:[%s1949_s8 + $0x38] sm:$0xff] %v1419_v8   ;;  %v1394_v11 = vpack.c.bf16 %v1028_v9, %v1027_v7 }
 0x131   : > { %1427 = vst [vmem:[%s1949_s8 + $0x18] sm:$0xff] %v1399_v10  }
 0x132   : > { %1430 = vst [vmem:[%s1949_s8 + $0x30] sm:$0xff] %v1414_v41   ;;  %1426 = vst [vmem:[%s1949_s8 + $0x10] sm:$0xff] %v1394_v11  }
 0x133 PF: > { %s15_s22 = sadd.s32 1, %s1738_s22   ;;  %s1993_s18 = smov %s1730_s20 }
 0x134   : > { %p12_p10 = scmp.ge.s32.totalorder %s15_s22, 6   ;;  %s1994_s19 = smov %s1734_s21 }
 0x135   : > { %s1995_s20 = smov %s1998_s23  ;;  %s1996_s21 = smov %s2002_s24 }
 0x136   :  { %14 = sbr.rel (!%p12_p10) target bundleno = 3 (0x3), region = 78 }

// kernel: basic_block_forward.3
= control target key start
LH: loop header
LB: loop body
LE: loop exit
PB: predicated region body
PF: predicated region fallthrough
CT: control target
= control target key end

     0   :  { %s1803_s21 = smov 0   ;;  %s1805_s22 = smov 0   ;;  %s2096_s0 = inlined_call_operand.vmem [shape: bf16[2,288,128], index: 0, kind: input, shape index: {}, may-alias: {0,1,2}]   ;;  %s2097_s1 = inlined_call_operand.vmem [shape: bf16[2,288,128], index: 1, kind: input, shape index: {}, may-alias: {0,1,2}]   ;;  %s2098_s2 = inlined_call_operand.vmem [shape: bf16[2,288,128], index: 2, kind: input, shape index: {}, may-alias: {0,1,2}]   ;;  %s2099_s3 = inlined_call_operand.vmem [shape: bf16[3,128,128], index: 3, kind: input, shape index: {}]   ;;  %s2100_s4 = inlined_call_operand.vmem [shape: f32[1,128], index: 4, kind: input, shape index: {}]   ;;  %s2101_s5 = inlined_call_operand.vmem [shape: bf16[2,256,128], index: 5, kind: input, shape index: {}]   ;;  %s2102_s6 = inlined_call_operand.vmem [shape: f32[2,256,128], index: 6, kind: output, shape index: {}]  }
   0x1   :  { %s1807_s23 = smov 0   ;;  %s1809_s24 = smov 0  }
   0x2   :  { %s1811_s25 = smov 0  }
   0x3 LB: > { %s25_s26 = sadd.s32 1, %s1758_s23  ;;  %s28_s27 = sadd.s32 1, %s1762_s24  ;;  %s1766_s25 = sphi %s1811_s25, %s16_s25   ;;  %s1762_s24 = sphi %s1809_s24, %s2106_s24   ;;  %s1758_s23 = sphi %s1807_s23, %s2105_s23   ;;  %s1754_s22 = sphi %s1805_s22, %s2104_s22   ;;  %s1750_s21 = sphi %s1803_s21, %s2103_s21  }
   0x4   : > { %p26_p0 = scmp.ge.s32.totalorder %s25_s26, 2  ;;  %p1318_p1 = scmp.ge.s32.totalorder %s1766_s25, 1 }
   0x5   : > { %p312_p2 = scmp.lt.s32.totalorder %s1766_s25, 5 }
   0x6   : > { %s2108_s26 = smov (%p26_p0, %s25_s26), 0  ;;  %s2110_s27 = smov (!%p26_p0, %s28_s27), %s1762_s24 }
   0x7   : > { %p313_p3 = pnand %p1318_p1, %p312_p2  ;;  %p30_p4 = scmp.ge.s32.totalorder %s2110_s27, 2 }
   0x8   : > { %v1694_v0 = vld [vmem:[%s2099_s3 + $0x40] sm:$0xff] (!%p313_p3)   ;;  %s1836_s30 = sshll.u32 (!%p313_p3), %s1750_s21, 4  ;;  %p391_p5 = scmp.lt.s32.totalorder (!%p313_p3), %s1754_s22, 1  ;;  %v1696_v2 = vld [vmem:[%s2099_s3 + $0x48] sm:$0xff] (!%p313_p3)   ;;  %v1698_v4 = vld [vmem:[%s2099_s3 + $0x50] sm:$0xff] (!%p313_p3)  }
   0x9   : > { %s2112_s27 = smov (%p30_p4, %s2110_s27), 0  ;;  %316 = sbr.rel (%p313_p3) target bundleno = 308 (0x134), region = 44 }
   0xa   : > { %v1695_v1 = vld [vmem:[%s2099_s3] sm:$0xff] (!%p313_p3)   ;;  %1509 = vmatprep.subr.bf16.mxu1 (!%p313_p3), %v1694_v0  ;;  %p393_p6 = scmp.lt.s32.totalorder (!%p313_p3), %s1836_s30, 35  ;;  %v1697_v3 = vld [vmem:[%s2099_s3 + $0x8] sm:$0xff] (!%p313_p3)   ;;  %v1699_v5 = vld [vmem:[%s2099_s3 + $0x10] sm:$0xff] (!%p313_p3)   ;;  %s1450_s8 = sadd.s32 (!%p313_p3), 16, %s1836_s30 }
   0xb   : > { %1541 = vmatprep.subr.bf16.mxu0 (!%p313_p3), %v1695_v1  ;;  %1510 = vmatpush3.bf16.msra.mxu1 (!%p313_p3), %v1694_v0  ;;  %v1700_v6 = vld [vmem:[%s2099_s3 + $0x58] sm:$0xff] (!%p313_p3)   ;;  %v1702_v8 = vld [vmem:[%s2099_s3 + $0x60] sm:$0xff] (!%p313_p3)   ;;  %v1704_v10 = vld [vmem:[%s2099_s3 + $0x68] sm:$0xff] (!%p313_p3)   ;;  %p409_p7 = scmp.lt.s32.totalorder (!%p313_p3), %s1450_s8, 35  ;;  %s1416_s21 = sadd.s32 (!%p313_p3), 2, %s1450_s8 }
   0xc   : > { %1542 = vmatpush3.bf16.msra.mxu0 (!%p313_p3), %v1695_v1  ;;  %1511 = vmatprep.subr.bf16.mxu1 (!%p313_p3), %v1696_v2  ;;  %v1701_v7 = vld [vmem:[%s2099_s3 + $0x18] sm:$0xff] (!%p313_p3)   ;;  %v1703_v9 = vld [vmem:[%s2099_s3 + $0x20] sm:$0xff] (!%p313_p3)   ;;  %v1705_v11 = vld [vmem:[%s2099_s3 + $0x28] sm:$0xff] (!%p313_p3)   ;;  %p424_p8 = scmp.lt.s32.totalorder (!%p313_p3), %s1416_s21, 35  ;;  %p437_p9 = scmp.lt.s32.totalorder (!%p313_p3), %s1836_s30, 31 }
   0xd   : > { %1543 = vmatprep.subr.bf16.mxu0 (!%p313_p3), %v1697_v3  ;;  %v1706_v14 = vld [vmem:[%s2099_s3 + $0x70] sm:$0xff] (!%p313_p3)   ;;  %v1708_v16 = vld [vmem:[%s2099_s3 + $0x78] sm:$0xff] (!%p313_p3)   ;;  %v1713_v18 = vld [vmem:[%s2099_s3 + $0x80] sm:$0xff] (!%p313_p3)  }
   0xe   : > { %v1707_v15 = vld [vmem:[%s2099_s3 + $0x30] sm:$0xff] (!%p313_p3)   ;;  %v1709_v17 = vld [vmem:[%s2099_s3 + $0x38] sm:$0xff] (!%p313_p3)   ;;  %v1714_v20 = vld [vmem:[%s2099_s3 + $0x88] sm:$0xff] (!%p313_p3)  }
   0xf   : > { %1512 = vmatpush3.bf16.msra.mxu1 (!%p313_p3), %v1696_v2  ;;  %v1717_v22 = vld [vmem:[%s2099_s3 + $0x90] sm:$0xff] (!%p313_p3)   ;;  %v1718_v24 = vld [vmem:[%s2099_s3 + $0x98] sm:$0xff] (!%p313_p3)   ;;  %v1721_v26 = vld [vmem:[%s2099_s3 + $0xa0] sm:$0xff] (!%p313_p3)  }
  0x10   : > { %s2114_s22 = smov (!%p391_p5, %s1754_s22), 1  ;;  %1544 = vmatpush3.bf16.msra.mxu0 %v1697_v3  ;;  %1513 = vmatprep.subr.bf16.mxu1 %v1698_v4  ;;  %s2116_s8 = smov (!%p409_p7, %s1450_s8), 35  ;;  %v1722_v28 = vld [vmem:[%s2099_s3 + $0xa8] sm:$0xff]   ;;  %v1725_v30 = vld [vmem:[%s2099_s3 + $0xb0] sm:$0xff]   ;;  %v1726_v32 = vld [vmem:[%s2099_s3 + $0xb8] sm:$0xff]  }
  0x11   : > { %s394_s15 = scalar_select %p393_p6, %s1836_s30, 35  ;;  %1545 = vmatprep.subr.bf16.mxu0 %v1699_v5 }
  0x12   : > { %s1858_s18 = smul.u32 36, %s2114_s22  ;;  %s2118_s21 = smov (!%p424_p8, %s1416_s21), 35 }
  0x13   : > { %1514 = vmatpush3.bf16.msra.mxu1 %v1698_v4  ;;  %s2120_s30 = smov (!%p437_p9, %s1836_s30), 31 }
  0x14   : > { %s396_s19 = sadd.s32 %s1858_s18, %s394_s15  ;;  %1546 = vmatpush3.bf16.msra.mxu0 %v1699_v5  ;;  %1515 = vmatprep.subr.bf16.mxu1 %v1700_v6  ;;  %s412_s10 = sadd.s32 %s1858_s18, %s2116_s8 }
  0x15   : > { %s1320_s7 = sshll.u32 %s396_s19, 2  ;;  %1547 = vmatprep.subr.bf16.mxu0 %v1701_v7  ;;  %s1900_s16 = sshll.u32 %s412_s10, 2 }
  0x16   : > { %s1877_s15 = scalar_lea.vmem %s2096_s0, %s1320_s7  ;;  %s427_s17 = sadd.s32 %s1858_s18, %s2118_s21 }
  0x17   : > { %1516 = vmatpush3.bf16.msra.mxu1 %v1700_v6  ;;  %v1710_v12 = vld [vmem:[%s1877_s15 + $0x8] sm:$0xff]   ;;  %v1711_v13 = vld [vmem:[%s1877_s15] sm:$0xff]   ;;  %s414_s29 = scalar_lea.vmem %s2097_s1, %s1900_s16  ;;  %s1910_s7 = sshll.u32 %s427_s17, 2  ;;  %v1712_v19 = vld [vmem:[%s1877_s15 + $0x10] sm:$0xff]  }
  0x18   : > { %1548 = vmatpush3.bf16.msra.mxu0 %v1701_v7  ;;  %1517 = vmatprep.subr.bf16.mxu1 %v1702_v8  ;;  %s429_s11 = scalar_lea.vmem %s2098_s2, %s1910_s7  ;;  %v1715_v21 = vld [vmem:[%s1877_s15 + $0x18] sm:$0xff]   ;;  %v1716_v23 = vld [vmem:[%s1877_s15 + $0x20] sm:$0xff]   ;;  %v1719_v25 = vld [vmem:[%s1877_s15 + $0x28] sm:$0xff]   ;;  %s1328_s7 = sshll.u32 %s2114_s22, 5 }
  0x19   : > { %1549 = vmatprep.subr.bf16.mxu0 %v1703_v9  ;;  %1525 = vmatprep.mubr.bf16.mxu1 %v1710_v12  ;;  %v1720_v27 = vld [vmem:[%s1877_s15 + $0x30] sm:$0xff]   ;;  %v1723_v29 = vld [vmem:[%s1877_s15 + $0x38] sm:$0xff]   ;;  %v1724_v31 = vld [vmem:[%s414_s29] sm:$0xff]  }
  0x1a   : > { %1557 = vmatprep.mubr.bf16.mxu0 %v1711_v13  ;;  %v1727_v33 = vld [vmem:[%s429_s11] sm:$0xff]   ;;  %s1972_s11 = sadd.s32 %s1328_s7, %s2120_s30 }
  0x1b   : > { %1518 = vmatpush3.bf16.msra.mxu1 %v1702_v8  ;;  %s1329_s13 = sshll.u32 %s1972_s11, 2  ;;  %s1332_s19 = sshll.u32 %s1972_s11, 3 }
  0x1c   : > { %1550 = vmatpush3.bf16.msra.mxu0 %v1703_v9  ;;  %1519 = vmatprep.subr.bf16.mxu1 %v1704_v10  ;;  %s442_s22 = scalar_lea.vmem %s2101_s5, %s1329_s13  ;;  %s2028_s18 = scalar_lea.vmem %s2102_s6, %s1332_s19 }
  0x1d   : > { %1551 = vmatprep.subr.bf16.mxu0 %v1705_v11  ;;  %v1982_v63 = vld [vmem:[%s442_s22 + $0x8] sm:$0xff]   ;;  %v1986_v3 = vld [vmem:[%s442_s22] sm:$0xff]   ;;  %v1990_v6 = vld [vmem:[%s442_s22 + $0x18] sm:$0xff]  }
  0x1e   : > { %v1457_v0 = vld [vmem:[%s442_s22 + $0x28] sm:$0xff]   ;;  %v1456_v4 = vld [vmem:[%s442_s22 + $0x20] sm:$0xff]   ;;  %v1992_v7 = vld [vmem:[%s442_s22 + $0x38] sm:$0xff]   ;;  %v1423_v8 = vunpack.c.l.bf16 %v1982_v63 }
  0x1f   : > { %1520 = vmatpush3.bf16.msra.mxu1 %v1704_v10  ;;  %v1439_v9 = vunpack.c.l.bf16 %v1457_v0  ;;  %v1995_v10 = vld [vmem:[%s442_s22 + $0x10] sm:$0xff]   ;;  %v1435_v13 = vunpack.c.l.bf16 %v1456_v4 }
  0x20   : > { %1552 = vmatpush3.bf16.msra.mxu0 %v1705_v11  ;;  %1521 = vmatprep.subr.bf16.mxu1 %v1706_v14  ;;  %v1997_v11 = vld [vmem:[%s442_s22 + $0x30] sm:$0xff]  }
  0x21   : > { %1553 = vmatprep.subr.bf16.mxu0 %v1707_v15 }
  0x23   : > { %1522 = vmatpush3.bf16.msra.mxu1 %v1706_v14  ;;  %v1424_v14 = vunpack.c.h.bf16 %v1982_v63 }
  0x24   : > { %1554 = vmatpush3.bf16.msra.mxu0 %v1707_v15  ;;  %1523 = vmatprep.subr.bf16.mxu1 %v1708_v16  ;;  %v1440_v15 = vunpack.c.h.bf16 %v1457_v0 }
  0x25   : > { %1555 = vmatprep.subr.bf16.mxu0 %v1709_v17 }
  0x27   : > { %1524 = vmatpush3.bf16.msra.mxu1 %v1708_v16  ;;  %v2004_v16 = vld [vmem:[%s2100_s4] ss:$0 sm:$0xff] }
  0x28   : > { %1556 = vmatpush3.bf16.msra.mxu0 %v1709_v17  ;;  %1605 = vmatprep.subr.bf16.mxu1 %v1713_v18 }
  0x29   : > { %1573 = vmatprep.subr.bf16.mxu0 %v1713_v18 }
  0x2a   : > { %1526 = vmatmul.mubr.bf16.vlgmr.msra.gmra.mrb[0].mxu1 %v1712_v19 }
  0x2b   : > { %1558 = vmatmul.mubr.bf16.vlgmr.msra.gmra.mrb[0].mxu0 %v1710_v12  ;;  %1613 = vmatpush3.bf16.msra.mxu1 %v1713_v18  ;;  %v1419_v12 = vunpack.c.l.bf16 %v1986_v3 }
  0x2c   : > { %1574 = vmatpush3.bf16.msra.mxu0 %v1713_v18  ;;  %1606 = vmatprep.subr.bf16.mxu1 %v1714_v20  ;;  %v1420_v18 = vunpack.c.h.bf16 %v1986_v3 }
  0x2d   : > { %1575 = vmatprep.subr.bf16.mxu0 %v1714_v20  ;;  %1529 = vmatprep.mubr.bf16.mxu1 %v1715_v21 }
  0x2e   : > { %1561 = vmatprep.mubr.bf16.mxu0 %v1712_v19 }
  0x2f   : > { %1614 = vmatpush3.bf16.msra.mxu1 %v1714_v20 }
  0x30   : > { %1576 = vmatpush3.bf16.msra.mxu0 %v1714_v20  ;;  %1607 = vmatprep.subr.bf16.mxu1 %v1717_v22  ;;  %v1431_v20 = vunpack.c.l.bf16 %v1990_v6 }
  0x31   : > { %1577 = vmatprep.subr.bf16.mxu0 %v1717_v22 }
  0x32   : > { %1530 = vmatmul.mubr.bf16.gmra.mrb[4].mxu1 %v1716_v23 }
  0x33   : > { %1562 = vmatmul.mubr.bf16.gmra.mrb[4].mxu0 %v1715_v21  ;;  %1615 = vmatpush3.bf16.msra.mxu1 %v1717_v22 }
  0x34   : > { %1578 = vmatpush3.bf16.msra.mxu0 %v1717_v22  ;;  %1608 = vmatprep.subr.bf16.mxu1 %v1718_v24 }
  0x35   : > { %1579 = vmatprep.subr.bf16.mxu0 %v1718_v24  ;;  %1533 = vmatprep.mubr.bf16.mxu1 %v1719_v25 }
  0x36   : > { %1565 = vmatprep.mubr.bf16.mxu0 %v1716_v23 }
  0x37   : > { %1616 = vmatpush3.bf16.msra.mxu1 %v1718_v24 }
  0x38   : > { %1580 = vmatpush3.bf16.msra.mxu0 %v1718_v24  ;;  %1609 = vmatprep.subr.bf16.mxu1 %v1721_v26 }
  0x39   : > { %1581 = vmatprep.subr.bf16.mxu0 %v1721_v26 }
  0x3a   : > { %1534 = vmatmul.mubr.bf16.gmra.mrb[8].mxu1 %v1720_v27 }
  0x3b   : > { %1566 = vmatmul.mubr.bf16.gmra.mrb[8].mxu0 %v1719_v25  ;;  %1617 = vmatpush3.bf16.msra.mxu1 %v1721_v26 }
  0x3c   : > { %1582 = vmatpush3.bf16.msra.mxu0 %v1721_v26  ;;  %1610 = vmatprep.subr.bf16.mxu1 %v1722_v28  ;;  %v1443_v26 = vunpack.c.l.bf16 %v1997_v11 }
  0x3d   : > { %1583 = vmatprep.subr.bf16.mxu0 %v1722_v28  ;;  %1537 = vmatprep.mubr.bf16.mxu1 %v1723_v29 }
  0x3e   : > { %1569 = vmatprep.mubr.bf16.mxu0 %v1720_v27 }
  0x3f   : > { %1618 = vmatpush3.bf16.msra.mxu1 %v1722_v28 }
  0x40   : > { %1584 = vmatpush3.bf16.msra.mxu0 %v1722_v28  ;;  %1611 = vmatprep.subr.bf16.mxu1 %v1725_v30 }
  0x41   : > { %1585 = vmatprep.subr.bf16.mxu0 %v1725_v30 }
  0x42   : > { %1538 = vmatmul.mubr.bf16.gmra.mrb[12].mxu1 %v1724_v31 }
  0x43   : > { %1570 = vmatmul.mubr.bf16.gmra.mrb[12].mxu0 %v1723_v29  ;;  %1619 = vmatpush3.bf16.msra.mxu1 %v1725_v30 }
  0x44   : > { %1586 = vmatpush3.bf16.msra.mxu0 %v1725_v30  ;;  %1612 = vmatprep.subr.bf16.mxu1 %v1726_v32 }
  0x45   : > { %1587 = vmatprep.subr.bf16.mxu0 %v1726_v32  ;;  %1589 = vmatprep.mubr.bf16.mxu0 %v1712_v19  ;;  %v1436_v19 = vunpack.c.h.bf16 %v1456_v4 }
  0x46   : > { %1597 = vmatprep.mubr.bf16.mxu1 %v1720_v27  ;;  %v1432_v27 = vunpack.c.h.bf16 %v1990_v6 }
  0x47   : > { %1620 = vmatpush3.bf16.msra.mxu1 %v1726_v32 }
  0x48   : > { %1588 = vmatpush3.bf16.msra.mxu0 %v1726_v32  ;;  %v1448_v32 = vunpack.c.h.bf16 %v1992_v7 }
  0x4a   : > { %1598 = vmatmul.mubr.bf16.vlgmr.msra.gmra.mrb[16].mxu1 %v1723_v29 }
  0x4b   : > { %1590 = vmatmul.mubr.bf16.vlgmr.msra.gmra.mrb[0].mxu0 %v1715_v21  ;;  %1601 = vmatprep.mubr.bf16.mxu1 %v1724_v31  ;;  %v1447_v21 = vunpack.c.l.bf16 %v1992_v7 }
  0x4c   : > { %1593 = vmatprep.mubr.bf16.mxu0 %v1716_v23 }
  0x52   : > { %1602 = vmatmul.mubr.bf16.gmra.mrb[20].mxu1 %v1727_v33  ;;  %v1428_v33 = vunpack.c.h.bf16 %v1995_v10 }
  0x53   : > { %1594 = vmatmul.mubr.bf16.gmra.mrb[4].mxu0 %v1719_v25  ;;  %v1427_v25 = vunpack.c.l.bf16 %v1995_v10 }
  0xfd   : > { %v1953_v34 = vpop.f32.mrb[0].mxu1 }
  0xfe   : > { %v1955_v35 = vpop.f32.mrb[1].mxu1 }
  0xff   : > { %v1957_v36 = vpop.f32.mrb[2].mxu1 }
 0x100   : > { %v1959_v37 = vpop.f32.mrb[3].mxu1 }
 0x105   : > { %v1961_v38 = vpop.f32.mrb[4].mxu1 }
 0x106   : > { %v1963_v39 = vpop.f32.mrb[5].mxu1 }
 0x107   : > { %v1965_v40 = vpop.f32.mrb[6].mxu1 }
 0x108   : > { %v1968_v41 = vpop.f32.mrb[7].mxu1 }
 0x10d   : > { %v1535_v42 = vpop.f32.mrb[8].mxu1 }
 0x10e   : > { %v1567_v43 = vpop.f32.mrb[8].mxu0  ;;  %v701_v44 = vpop.f32.mrb[9].mxu1 }
 0x10f   : > { %v855_v45 = vadd.f32 %v1567_v43, %v1535_v42  ;;  %v846_v46 = vpop.f32.mrb[9].mxu0  ;;  %v1536_v47 = vpop.f32.mrb[10].mxu1 }
 0x110   : > { %v847_v48 = vadd.f32 %v846_v46, %v701_v44  ;;  %v1568_v49 = vpop.f32.mrb[10].mxu0  ;;  %v704_v50 = vpop.f32.mrb[11].mxu1 }
 0x111   : > { %v858_v51 = vadd.f32 %v1568_v49, %v1536_v47  ;;  %v849_v52 = vpop.f32.mrb[11].mxu0  ;;  %v1444_v47 = vunpack.c.h.bf16 %v1997_v11 }
 0x112   : > { %v850_v53 = vadd.f32 %v849_v52, %v704_v50 }
 0x115   : > { %v1539_v54 = vpop.f32.mrb[12].mxu1 }
 0x116   : > { %v1571_v55 = vpop.f32.mrb[12].mxu0  ;;  %v717_v56 = vpop.f32.mrb[13].mxu1 }
 0x117   : > { %v1978_v57 = vadd.f32 %v1571_v55, %v1539_v54  ;;  %v862_v58 = vpop.f32.mrb[13].mxu0  ;;  %v1540_v59 = vpop.f32.mrb[14].mxu1 }
 0x118   : > { %v1980_v60 = vadd.f32 %v862_v58, %v717_v56  ;;  %v1572_v61 = vpop.f32.mrb[14].mxu0  ;;  %v720_v62 = vpop.f32.mrb[15].mxu1 }
 0x119   : > { %v1984_v1 = vadd.f32 %v1572_v61, %v1540_v59  ;;  %v865_v2 = vpop.f32.mrb[15].mxu0 }
 0x11a   : > { %v1988_v5 = vadd.f32 %v865_v2, %v720_v62 }
 0x11d   : > { %v1599_v17 = vpop.f32.mrb[16].mxu1 }
 0x11e   : > { %v1591_v22 = vpop.f32.mrb[0].mxu0  ;;  %v1057_v23 = vadd.f32 %v1599_v17, %v855_v45  ;;  %v1016_v24 = vpop.f32.mrb[17].mxu1 }
 0x11f   : > { %v1621_v28 = vadd.f32 %v1591_v22, %v1953_v34  ;;  %v984_v29 = vpop.f32.mrb[1].mxu0  ;;  %v1055_v30 = vadd.f32 %v1016_v24, %v847_v48  ;;  %v1600_v31 = vpop.f32.mrb[18].mxu1 }
 0x120   : > { %v1080_v42 = vadd.f32 %v2004_v16, %v1057_v23  ;;  %v1622_v43 = vadd.f32 %v984_v29, %v1955_v35  ;;  %v1592_v44 = vpop.f32.mrb[2].mxu0  ;;  %v1058_v45 = vadd.f32 %v1600_v31, %v858_v51  ;;  %v1019_v46 = vpop.f32.mrb[19].mxu1 }
 0x121   : > { %v1072_v49 = vadd.f32 %v1621_v28, %v2004_v16  ;;  %v1078_v34 = vadd.f32 %v2004_v16, %v1055_v30  ;;  %v1623_v48 = vadd.f32 %v1592_v44, %v1957_v36  ;;  %v987_v50 = vpop.f32.mrb[3].mxu0  ;;  %v1056_v52 = vadd.f32 %v1019_v46, %v850_v53 }
 0x122   : > { %v1128_v54 = vadd.f32 %v1439_v9, %v1080_v42  ;;  %v1070_v55 = vadd.f32 %v1622_v43, %v2004_v16  ;;  %v1081_v56 = vadd.f32 %v2004_v16, %v1058_v45  ;;  %v1624_v35 = vadd.f32 %v987_v50, %v1959_v37 }
 0x123   : > { %v1120_v51 = vadd.f32 %v1423_v8, %v1072_v49  ;;  %v1126_v58 = vadd.f32 %v1435_v13, %v1078_v34  ;;  %v1073_v59 = vadd.f32 %v1623_v48, %v2004_v16  ;;  %v1079_v36 = vadd.f32 %v2004_v16, %v1056_v52 }
 0x124   : > { %v1144_v53 = vmax.f32 %v1128_v54, 0.0  ;;  %v1118_v61 = vadd.f32 %v1419_v12, %v1070_v55  ;;  %v1129_v62 = vadd.f32 %v1440_v15, %v1081_v56  ;;  %v1071_v63 = vadd.f32 %v1624_v35, %v2004_v16 }
 0x125   : > { %v1136_v37 = vmax.f32 %v1120_v51, 0.0  ;;  %v1142_v0 = vmax.f32 %v1126_v58, 0.0  ;;  %v1121_v2 = vadd.f32 %v1424_v14, %v1073_v59  ;;  %v1127_v3 = vadd.f32 %v1436_v19, %v1079_v36  ;;  %v1603_v4 = vpop.f32.mrb[20].mxu1 }
 0x126   : > { %1160 = vst [vmem:[%s2028_s18 + $0x50] sm:$0xff] %v1144_v53  ;;  %v1134_v8 = vmax.f32 %v1118_v61, 0.0  ;;  %v1145_v9 = vmax.f32 %v1129_v62, 0.0  ;;  %v1119_v13 = vadd.f32 %v1420_v18, %v1071_v63  ;;  %v1595_v17 = vpop.f32.mrb[4].mxu0  ;;  %v1061_v22 = vadd.f32 %v1603_v4, %v1978_v57  ;;  %v1032_v23 = vpop.f32.mrb[21].mxu1 }
 0x127   : > { %1152 = vst [vmem:[%s2028_s18 + $0x10] sm:$0xff] %v1136_v37  ;;  %1158 = vst [vmem:[%s2028_s18 + $0x40] sm:$0xff] %v1142_v0  ;;  %v1137_v12 = vmax.f32 %v1121_v2, 0.0  ;;  %v1143_v15 = vmax.f32 %v1127_v3, 0.0  ;;  %v1625_v14 = vadd.f32 %v1595_v17, %v1961_v38  ;;  %v1000_v19 = vpop.f32.mrb[5].mxu0  ;;  %v1059_v24 = vadd.f32 %v1032_v23, %v1980_v60  ;;  %v1604_v28 = vpop.f32.mrb[22].mxu1 }
 0x128   : > { %1150 = vst [vmem:[%s2028_s18] sm:$0xff] %v1134_v8  ;;  %1161 = vst [vmem:[%s2028_s18 + $0x58] sm:$0xff] %v1145_v9  ;;  %v1135_v18 = vmax.f32 %v1119_v13, 0.0  ;;  %v1084_v29 = vadd.f32 %v2004_v16, %v1061_v22  ;;  %v1626_v57 = vadd.f32 %v1000_v19, %v1963_v39  ;;  %v1596_v30 = vpop.f32.mrb[6].mxu0  ;;  %v1062_v31 = vadd.f32 %v1604_v28, %v1984_v1  ;;  %v1035_v42 = vpop.f32.mrb[23].mxu1 }
 0x129   : > { %1153 = vst [vmem:[%s2028_s18 + $0x18] sm:$0xff] %v1137_v12  ;;  %1159 = vst [vmem:[%s2028_s18 + $0x48] sm:$0xff] %v1143_v15  ;;  %v1076_v38 = vadd.f32 %v1625_v14, %v2004_v16  ;;  %v1082_v43 = vadd.f32 %v2004_v16, %v1059_v24  ;;  %v1627_v60 = vadd.f32 %v1596_v30, %v1965_v40  ;;  %v1003_v44 = vpop.f32.mrb[7].mxu0 }
 0x12a   : > { %v1060_v45 = vadd.f32 %v1035_v42, %v1988_v5  ;;  %1151 = vst [vmem:[%s2028_s18 + $0x8] sm:$0xff] %v1135_v18  ;;  %v1132_v46 = vadd.f32 %v1447_v21, %v1084_v29  ;;  %v1074_v39 = vadd.f32 %v1626_v57, %v2004_v16  ;;  %v1085_v1 = vadd.f32 %v2004_v16, %v1062_v31 }
 0x12b   : > { %v1628_v49 = vadd.f32 %v1003_v44, %v1968_v41  ;;  %v1124_v34 = vadd.f32 %v1431_v20, %v1076_v38  ;;  %v1130_v40 = vadd.f32 %v1443_v26, %v1082_v43  ;;  %v1077_v5 = vadd.f32 %v1627_v60, %v2004_v16 }
 0x12c   : > { %v1083_v48 = vadd.f32 %v2004_v16, %v1060_v45  ;;  %v1148_v21 = vmax.f32 %v1132_v46, 0.0  ;;  %v1122_v50 = vadd.f32 %v1427_v25, %v1074_v39  ;;  %v1133_v41 = vadd.f32 %v1448_v32, %v1085_v1 }
 0x12d   : > { %v1075_v20 = vadd.f32 %v1628_v49, %v2004_v16  ;;  %v1140_v52 = vmax.f32 %v1124_v34, 0.0  ;;  %v1146_v26 = vmax.f32 %v1130_v40, 0.0  ;;  %v1125_v54 = vadd.f32 %v1432_v27, %v1077_v5 }
 0x12e   : > { %v1131_v55 = vadd.f32 %v1444_v47, %v1083_v48  ;;  %1164 = vst [vmem:[%s2028_s18 + $0x70] sm:$0xff] %v1148_v21  ;;  %v1138_v56 = vmax.f32 %v1122_v50, 0.0  ;;  %v1149_v25 = vmax.f32 %v1133_v41, 0.0 }
 0x12f   : > { %v1123_v7 = vadd.f32 %v1428_v33, %v1075_v20  ;;  %1156 = vst [vmem:[%s2028_s18 + $0x30] sm:$0xff] %v1140_v52  ;;  %1162 = vst [vmem:[%s2028_s18 + $0x60] sm:$0xff] %v1146_v26  ;;  %v1141_v16 = vmax.f32 %v1125_v54, 0.0 }
 0x130   : > { %v1147_v32 = vmax.f32 %v1131_v55, 0.0  ;;  %1154 = vst [vmem:[%s2028_s18 + $0x20] sm:$0xff] %v1138_v56  ;;  %1165 = vst [vmem:[%s2028_s18 + $0x78] sm:$0xff] %v1149_v25 }
 0x131   : > { %v1139_v35 = vmax.f32 %v1123_v7, 0.0  ;;  %1157 = vst [vmem:[%s2028_s18 + $0x38] sm:$0xff] %v1141_v16 }
 0x132   : > { %1163 = vst [vmem:[%s2028_s18 + $0x68] sm:$0xff] %v1147_v32 }
 0x133   : > { %1155 = vst [vmem:[%s2028_s18 + $0x28] sm:$0xff] %v1139_v35 }
 0x134 PF: > { %s16_s25 = sadd.s32 1, %s1766_s25   ;;  %s2103_s21 = smov %s1758_s23 }
 0x135   : > { %p13_p10 = scmp.ge.s32.totalorder %s16_s25, 6   ;;  %s2104_s22 = smov %s1762_s24 }
 0x136   : > { %s2105_s23 = smov %s2108_s26  ;;  %s2106_s24 = smov %s2112_s27 }
 0x137   :  { %15 = sbr.rel (!%p13_p10) target bundleno = 3 (0x3), region = 85 }

</bundles_post_ra>
